<compile_context>
chip_gen: v7x
topology: tpu7x:2x2x1
jax: 0.10.0
libtpu: 0.0.40
codegen_flags: <defaults>
</compile_context>

<pallas_src>
import functools
import math

import jax
import jax.numpy as jnp
from jax.experimental import pallas as pl
from jax.experimental.pallas import tpu as pltpu


def sfdp_kernel(x_ref, w_ref, b_ref, o_ref, *, mask, scale):
    """One batch element per grid step.

    x_ref: (1, S, D) VMEM   -- input rows for this batch element
    w_ref: (D, 3)   VMEM   -- fused [wq | wk | wv] (pre-packed at init)
    b_ref: (1, 3)   VMEM   -- fused [bq, bk, bv]   (pre-packed at init)
    o_ref: (1, S, 1) VMEM  -- output
    mask, scale: Python floats closed over (mask=1, scale=1/sqrt(6)).
    """
    x = x_ref[0]                                                  # (S, D) f32
    S = x.shape[0]

    # Single fused projection on the MXU + one fused bias add:
    # (S, D) @ (D, 3) -> (S, 3), then + (1, 3).
    qkv = jnp.dot(x, w_ref[...], preferred_element_type=jnp.float32) + b_ref[...]

    q = qkv[:, 0:1]                                               # (S, 1)
    k = qkv[:, 1:2]                                               # (S, 1)
    v = qkv[:, 2:3]                                               # (S, 1)

    # One fused sublane reduction over the slab [k, v, k*v]  -> (1, 3).
    slab = jnp.concatenate([k, v, k * v], axis=1)                 # (S, 3)
    sums = jnp.sum(slab, axis=0, keepdims=True)                   # (1, 3)
    sum_k = sums[:, 0:1]                                          # (1, 1)
    sum_v = sums[:, 1:2]                                          # (1, 1)
    kv = sums[:, 2:3]                                             # (1, 1)

    # Rank-1 closed form of  ((q k^T / sqrt(6) + mask) / rowsum) @ v
    num = q * (kv * scale) + mask * sum_v                         # (S, 1)
    den = q * (sum_k * scale) + jnp.float32(S) * mask             # (S, 1)

    o_ref[0] = num / den                                          # exact divide


def pack_params(wq, bq, wk, bk, wv, bv):
    """Init-time (NOT per-call) packing of the three Linear(6,1) layers."""
    w_qkv = jnp.concatenate([wq.T, wk.T, wv.T], axis=1).astype(jnp.float32)   # (D, 3)
    b_qkv = jnp.concatenate(
        [bq.reshape(1), bk.reshape(1), bv.reshape(1)]
    ).reshape(1, 3).astype(jnp.float32)                                       # (1, 3)
    return w_qkv, b_qkv


def sfdp_forward(x, w_qkv, b_qkv, *, mask):
    """x: (B, S, D) f32; w_qkv: (D, 3); b_qkv: (1, 3); mask: Python float."""
    B, S, D = x.shape
    kernel = functools.partial(
        sfdp_kernel, mask=float(mask), scale=1.0 / math.sqrt(6.0)
    )
    return pl.pallas_call(
        kernel,
        out_shape=jax.ShapeDtypeStruct((B, S, 1), jnp.float32),
        grid=(B,),
        in_specs=[
            pl.BlockSpec((1, S, D), lambda b: (b, 0, 0)),   # per-batch rows
            pl.BlockSpec((D, 3), lambda b: (0, 0)),         # weights: resident
            pl.BlockSpec((1, 3), lambda b: (0, 0)),         # biases: resident
        ],
        out_specs=pl.BlockSpec((1, S, 1), lambda b: (b, 0, 0)),
        compiler_params=pltpu.CompilerParams(
            dimension_semantics=("parallel",),
        ),
    )(x, w_qkv, b_qkv)


def sfdp_reference(x, wq, bq, wk, bk, wv, bv, mask):
    # Direct (batched) transcription of the PyTorch forward:
    # plain sum normalization, NOT softmax.
    q = x @ wq.T + bq                                    # (B, S, 1)
    k = x @ wk.T + bk                                    # (B, S, 1)
    v = x @ wv.T + bv                                    # (B, S, 1)
    s = q @ jnp.swapaxes(k, -2, -1) / math.sqrt(6.0)     # (B, S, S)
    s = s + mask
    s = s / jnp.sum(s, axis=-1, keepdims=True)
    return s @ v                                         # (B, S, 1)


if __name__ == "__main__":
    key = jax.random.PRNGKey(0)
    kx, kwq, kbq, kwk, kbk, kwv, kbv = jax.random.split(key, 7)

    # in_features fixed at 6 by the module; small batch of independent problems.
    B, S, D = 4, 8, 6
    x = jax.random.normal(kx, (B, S, D), dtype=jnp.float32)

    # Deterministic Linear(6, 1) params, PyTorch-style uniform(-1/sqrt(6), 1/sqrt(6)).
    bound = 1.0 / math.sqrt(D)
    wq = jax.random.uniform(kwq, (1, D), jnp.float32, -bound, bound)
    bq = jax.random.uniform(kbq, (1,), jnp.float32, -bound, bound)
    wk = jax.random.uniform(kwk, (1, D), jnp.float32, -bound, bound)
    bk = jax.random.uniform(kbk, (1,), jnp.float32, -bound, bound)
    wv = jax.random.uniform(kwv, (1, D), jnp.float32, -bound, bound)
    bv = jax.random.uniform(kbv, (1,), jnp.float32, -bound, bound)
    mask = 1  # scalar Python constant, as in the PyTorch script

    # Init-time packing (outside the jitted per-call path).
    w_qkv, b_qkv = pack_params(wq, bq, wk, bk, wv, bv)

    fwd = jax.jit(functools.partial(sfdp_forward, mask=float(mask)))
    out = fwd(x, w_qkv, b_qkv)
    out = jax.block_until_ready(out)

    ref = sfdp_reference(x, wq, bq, wk, bk, wv, bv, float(mask))
    assert out.shape == (B, S, 1)
    assert jnp.allclose(out, ref, atol=1e-4, rtol=1e-4), (out, ref)

    # NOTE: the torch forward() also prints tensor sizes; that side effect has
    # no compute semantics and is intentionally omitted from the kernel.
    print("KERNEL_OK")
</pallas_src>

<mosaic_0001>
module attributes {stable_mosaic.version = 11 : i64} {
  func.func @sfdp_kernel(%arg0: i32, %arg1: memref<1x8x6xf32, #tpu.memory_space<vmem>>, %arg2: memref<6x3xf32, #tpu.memory_space<vmem>>, %arg3: memref<1x3xf32, #tpu.memory_space<vmem>>, %arg4: memref<1x8x1xf32, #tpu.memory_space<vmem>>) attributes {dimension_semantics = [#tpu.dimension_semantics<parallel>], iteration_bounds = array<i64: 4>, scalar_prefetch = 0 : i64, scratch_operands = 0 : i64, tpu.core_type = #tpu.core_type<tc>, window_params = [{transform_indices = @transform_0, window_bounds = array<i64: 1, 8, 6>}, {pipeline_mode = #tpu.pipeline_mode<synchronous>, transform_indices = @transform_1, window_bounds = array<i64: 6, 3>}, {pipeline_mode = #tpu.pipeline_mode<synchronous>, transform_indices = @transform_2, window_bounds = array<i64: 1, 3>}, {transform_indices = @transform_3, window_bounds = array<i64: 1, 8, 1>}]} {
    %c0 = arith.constant 0 : index
    %c0_0 = arith.constant 0 : index
    %c0_1 = arith.constant 0 : index
    %0 = vector.load %arg1[%c0, %c0_0, %c0_1] : memref<1x8x6xf32, #tpu.memory_space<vmem>>, vector<1x8x6xf32>
    %1 = vector.shape_cast %0 : vector<1x8x6xf32> to vector<8x6xf32>
    %c0_2 = arith.constant 0 : index
    %c0_3 = arith.constant 0 : index
    %2 = vector.load %arg2[%c0_2, %c0_3] : memref<6x3xf32, #tpu.memory_space<vmem>>, vector<6x3xf32>
    %cst = arith.constant dense<0.000000e+00> : vector<8x3xf32>
    %3 = tpu.matmul %1, %2, %cst {dimension_numbers = #tpu.dot_dimension_numbers<[1], [0], [0], [1], [0, 0, 1, 1], [], []>} : vector<8x6xf32>, vector<6x3xf32>, vector<8x3xf32> -> vector<8x3xf32>
    %c0_4 = arith.constant 0 : index
    %c0_5 = arith.constant 0 : index
    %4 = vector.load %arg3[%c0_4, %c0_5] : memref<1x3xf32, #tpu.memory_space<vmem>>, vector<1x3xf32>
    %5 = vector.broadcast %4 : vector<1x3xf32> to vector<8x3xf32>
    %6 = arith.addf %3, %5 : vector<8x3xf32>
    %7 = vector.extract_strided_slice %6 {offsets = [0, 0], sizes = [8, 1], strides = [1, 1]} : vector<8x3xf32> to vector<8x1xf32>
    %8 = vector.extract_strided_slice %6 {offsets = [0, 1], sizes = [8, 1], strides = [1, 1]} : vector<8x3xf32> to vector<8x1xf32>
    %9 = vector.extract_strided_slice %6 {offsets = [0, 2], sizes = [8, 1], strides = [1, 1]} : vector<8x3xf32> to vector<8x1xf32>
    %10 = arith.mulf %8, %9 : vector<8x1xf32>
    %11 = tpu.concatenate %8, %9, %10 in 1 : vector<8x1xf32>, vector<8x1xf32>, vector<8x1xf32> -> vector<8x3xf32>
    %cst_6 = arith.constant dense<0.000000e+00> : vector<3xf32>
    %12 = vector.multi_reduction <add>, %11, %cst_6 [0] : vector<8x3xf32> to vector<3xf32>
    %13 = vector.shape_cast %12 : vector<3xf32> to vector<1x3xf32>
    %14 = vector.extract_strided_slice %13 {offsets = [0, 0], sizes = [1, 1], strides = [1, 1]} : vector<1x3xf32> to vector<1x1xf32>
    %15 = vector.extract_strided_slice %13 {offsets = [0, 1], sizes = [1, 1], strides = [1, 1]} : vector<1x3xf32> to vector<1x1xf32>
    %16 = vector.extract_strided_slice %13 {offsets = [0, 2], sizes = [1, 1], strides = [1, 1]} : vector<1x3xf32> to vector<1x1xf32>
    %cst_7 = arith.constant 0.408248305 : f32
    %17 = vector.broadcast %cst_7 : f32 to vector<1x1xf32>
    %18 = arith.mulf %16, %17 : vector<1x1xf32>
    %19 = vector.broadcast %18 : vector<1x1xf32> to vector<8x1xf32>
    %20 = arith.mulf %7, %19 : vector<8x1xf32>
    %cst_8 = arith.constant 1.000000e+00 : f32
    %21 = vector.broadcast %cst_8 : f32 to vector<1x1xf32>
    %22 = arith.mulf %21, %15 : vector<1x1xf32>
    %23 = vector.broadcast %22 : vector<1x1xf32> to vector<8x1xf32>
    %24 = arith.addf %20, %23 : vector<8x1xf32>
    %cst_9 = arith.constant 0.408248305 : f32
    %25 = vector.broadcast %cst_9 : f32 to vector<1x1xf32>
    %26 = arith.mulf %14, %25 : vector<1x1xf32>
    %27 = vector.broadcast %26 : vector<1x1xf32> to vector<8x1xf32>
    %28 = arith.mulf %7, %27 : vector<8x1xf32>
    %cst_10 = arith.constant 8.000000e+00 : f32
    %cst_11 = arith.constant 1.000000e+00 : f32
    %29 = arith.mulf %cst_10, %cst_11 : f32
    %30 = vector.broadcast %29 : f32 to vector<8x1xf32>
    %31 = arith.addf %28, %30 : vector<8x1xf32>
    %32 = arith.divf %24, %31 : vector<8x1xf32>
    %c0_12 = arith.constant 0 : index
    %c0_13 = arith.constant 0 : index
    %c0_14 = arith.constant 0 : index
    %33 = vector.load %arg4[%c0_12, %c0_13, %c0_14] : memref<1x8x1xf32, #tpu.memory_space<vmem>>, vector<1x8x1xf32>
    %34 = vector.shape_cast %33 : vector<1x8x1xf32> to vector<8x1xf32>
    %35 = vector.shape_cast %32 : vector<8x1xf32> to vector<1x8x1xf32>
    tpu.vector_store %arg4[%c0_12, %c0_13, %c0_14], %35 {strides = array<i32>} : memref<1x8x1xf32, #tpu.memory_space<vmem>>, vector<1x8x1xf32>,
    return
  }
  func.func @transform_0(%arg0: i32) -> (i32, i32, i32) {
    %c0_i32 = arith.constant 0 : i32
    %c0_i32_0 = arith.constant 0 : i32
    %c0_i32_1 = arith.constant 0 : i32
    return %arg0, %c0_i32, %c0_i32_0 : i32, i32, i32
  }
  func.func @transform_1(%arg0: i32) -> (i32, i32) {
    %c0_i32 = arith.constant 0 : i32
    %c0_i32_0 = arith.constant 0 : i32
    %c0_i32_1 = arith.constant 0 : i32
    return %c0_i32, %c0_i32_0 : i32, i32
  }
  func.func @transform_2(%arg0: i32) -> (i32, i32) {
    %c0_i32 = arith.constant 0 : i32
    %c0_i32_0 = arith.constant 0 : i32
    %c0_i32_1 = arith.constant 0 : i32
    return %c0_i32, %c0_i32_0 : i32, i32
  }
  func.func @transform_3(%arg0: i32) -> (i32, i32, i32) {
    %c0_i32 = arith.constant 0 : i32
    %c0_i32_0 = arith.constant 0 : i32
    %c0_i32_1 = arith.constant 0 : i32
    return %arg0, %c0_i32, %c0_i32_0 : i32, i32, i32
  }
}

</mosaic_0001>

<bundles_post_ra>
// kernel: sfdp_forward.1
= control target key start
LH: loop header
LB: loop body
LE: loop exit
PB: predicated region body
PF: predicated region fallthrough
CT: control target
= control target key end

     0   :  { %s409_s12 = smov 0   ;;  %s439_s0 = inlined_call_operand.vmem [shape: f32[4,8,6], index: 0, kind: input, shape index: {}]   ;;  %s440_s1 = inlined_call_operand.vmem [shape: f32[6,3], index: 1, kind: input, shape index: {}]   ;;  %s441_s2 = inlined_call_operand.vmem [shape: f32[1,3], index: 2, kind: input, shape index: {}]   ;;  %s442_s3 = inlined_call_operand.vmem [shape: f32[4,8,1], index: 3, kind: output, shape index: {}]  }
   0x1 LB: > { %s342_s13 = sadd.s32 4294967295, %s382_s12   ;;  %p346_p0 = scmp.ge.s32.totalorder %s382_s12, 1  ;;  %s382_s12 = sphi %s409_s12, %s13_s12  }
   0x2   : > { %p136_p1 = scmp.lt.s32.totalorder %s382_s12, 5 }
   0x4   : > { %p137_p2 = pnand %p346_p0, %p136_p1 }
   0x5   : > { %v167_v0 = vld [vmem:[%s440_s1] sm:$0x3f] (!%p137_p2)  ;;  %vm179_vm0 = vcmask (!%p137_p2), 1045504   ;;  %p158_p3 = scmp.lt.s32.totalorder (!%p137_p2), %s342_s13, 3  ;;  %v384_v1 = vmov (!%p137_p2), 0.0   ;;  %vm385_vm1 = vmmov (!%p137_p2), 0  }
   0x6   : > { %140 = sbr.rel (%p137_p2) target bundleno = 603 (0x25b), region = 32  ;;  %356 = vmatprep.subr.mxu0 (!%p137_p2), %v384_v1  ;;  %358 = vmatprep.mubr.msk.f32.mxu0 (!%p137_p2), %vm385_vm1, %v384_v1  ;;  %vm175_vm2 = vcmask (!%p137_p2), 48128   ;;  %v349_v3 = vld [vmem:[%s441_s2] ss:$0 sm:$0xff] (!%p137_p2)  ;;  %s386_s22 = smov (!%p137_p2), 127   ;;  %vm263_vm3 = vcmask (!%p137_p2), 15360  }
   0x7   : > { %357 = vmatpush3.msk.msra.mxu0 (!%p137_p2), %vm179_vm0, %v167_v0  ;;  %s387_s23 = smov (!%p137_p2), 1   ;;  %vm265_vm4 = vcmask (!%p137_p2), 23552   ;;  %s388_s24 = smov (!%p137_p2), 126   ;;  %vm262_vm5 = vcmask (!%p137_p2), 7168  }
   0xd   : > { %s444_s13 = smov (!%p158_p3, %s342_s13), 3 }
   0xe   : > { %s347_s16 = sshll.u32 %s444_s13, 3 }
   0xf   : > { %s161_s19 = scalar_lea.vmem %s439_s0, %s347_s16  ;;  %s165_s27 = scalar_lea.vmem %s442_s3, %s347_s16 }
  0x10   : > { %v166_v2 = vld [vmem:[%s161_s19] sm:$0xff] }
  0x11   : > { %359 = vmatmul.mubr.msk.f32.vlgmr.msra.gmra.mrb[0].mxu0 %vm175_vm2, %v166_v2 }
  0xe4   : > { %v249_v4 = vpop.f32.mrb[0].mxu0 }
  0xe5   : > { %v250_v5 = vadd.f32 %v349_v3, %v249_v4  ;;  %v360_v6 = vpop.f32.mrb[1].mxu0 }
  0xe7   : > { %254 = vrot.lane.b32.xlu0 %v250_v5, %s386_s22 }
 0x159   : > { %v255_v7 = vpop.permute.xlu0 %254 }
 0x15a   : > { %v257_v8 = vmul.f32 %v255_v7, %v250_v5 }
 0x15c   : > { %259 = vrot.lane.b32.xlu0 %v257_v8, %s387_s23 }
 0x1ce   : > { %v260_v9 = vpop.permute.xlu0 %259 }
 0x1cf   : > { %v264_v10 = vsel %vm263_vm3, %v255_v7, %v260_v9 }
 0x1d0   : > { %v266_v11 = vsel %vm265_vm4, %v264_v10, 0.0 }
 0x1d1   : > { %v267_v12 = vrot.slane %v266_v11, 4 }
 0x1d3   : > { %v268_v13 = vadd.f32 %v267_v12, %v266_v11 }
 0x1d5   : > { %v269_v14 = vrot.slane %v268_v13, 2 }
 0x1d7   : > { %v270_v15 = vadd.f32 %v269_v14, %v268_v13 }
 0x1d9   : > { %v271_v16 = vrot.slane %v270_v15, 1 }
 0x1db   : > { %v272_v17 = vadd.f32 %v271_v16, %v270_v15 }
 0x1dd   : > { %v273_v18 = vmul.f32 0.4082483, %v272_v17 }
 0x1df   : > { %275 = vrot.lane.b32.xlu1 %v273_v18, %s388_s24  ;;  %v284_v19 = vmul.f32 %v273_v18, %v250_v5 }
 0x1e1   : > { %v285_v20 = vadd.f32 8.0, %v284_v19 }
 0x1e3   : > { %280 = vrot.lane.b32.xlu1 %v272_v17, %s386_s22  ;;  %374 = vrcp.f32 %v285_v20 }
 0x1ed   : > { %v375_v25 = vpop.eup %374 }
 0x251   : > { %v276_v21 = vpop.permute.xlu1 %275 }
 0x252   : > { %v278_v22 = vmul.f32 %v276_v21, %v250_v5 }
 0x255   : > { %v281_v23 = vpop.permute.xlu1 %280 }
 0x256   : > { %v283_v24 = vadd.f32 %v281_v23, %v278_v22 }
 0x258   : > { %v287_v26 = vmul.f32 %v375_v25, %v283_v24 }
 0x25a   : > { %288 = vst.msk [vmem:[%s165_s27] sm:$0xff] %vm262_vm5, %v287_v26 }
 0x25b PF: > { %s13_s12 = sadd.s32 1, %s382_s12  }
 0x25c   : > { %p10_p4 = scmp.ge.s32.totalorder %s13_s12, 6  }
 0x25e   :  { %12 = sbr.rel (!%p10_p4) target bundleno = 1 (0x1), region = 62 }

</bundles_post_ra>
